<compile_context>
chip_gen: v5e
topology: v5e:2x2
jax: 0.10.0
libtpu: 0.0.40
codegen_flags: <defaults>
</compile_context>

<pallas_src>
import functools

import jax
import jax.numpy as jnp
from jax.experimental import pallas as pl
from jax.experimental.pallas import tpu as pltpu


def _round_up(x: int, m: int) -> int:
    return (x + m - 1) // m * m


def _meta_linear_kernel(x_ref, w_ref, b_ref, o_ref, acc_ref):
    # x_ref: (tm, tk), w_ref: (tk, tn), b_ref: (1, tn) f32, o_ref: (tm, tn)
    # acc_ref: (tm, tn) f32 VMEM scratch, resident across the K grid axis.
    k = pl.program_id(2)

    @pl.when(k == 0)
    def _():
        acc_ref[...] = jnp.zeros_like(acc_ref)

    acc_ref[...] += jnp.dot(
        x_ref[...], w_ref[...], preferred_element_type=jnp.float32
    )

    # Epilogue (bias add, cast, store) only on the last K step: keeps the inner
    # loop pure vmatmul and avoids re-loading / re-broadcasting bias per K step.
    @pl.when(k == pl.num_programs(2) - 1)
    def _():
        o_ref[...] = (acc_ref[...] + b_ref[...]).astype(o_ref.dtype)


@functools.partial(jax.jit, static_argnames=("compute_dtype",))
def meta_linear(x, weight, bias, *, compute_dtype=None):
    """Pallas implementation of F.linear(x, weight, bias).

    x:      (..., in_features)
    weight: (out_features, in_features)   -- PyTorch nn.Linear convention
    bias:   (out_features,)
    compute_dtype: optional dtype (e.g. jnp.bfloat16) for the MXU inputs;
                   accumulation is always f32, output keeps x.dtype.
    returns (..., out_features)
    """
    out_dtype = x.dtype
    *lead, in_features = x.shape
    out_features = weight.shape[0]

    x2 = x.reshape(-1, in_features)
    m = x2.shape[0]

    if compute_dtype is not None:
        x2 = x2.astype(compute_dtype)
        weight = weight.astype(compute_dtype)
    cdt = x2.dtype

    # One-time HBM transpose: (out, in) -> (in, out) so the kernel contracts
    # ((1,), (0,)) -- canonical MXU feed, no per-tile transpose.
    wt = weight.T

    # ---- tile selection (VMEM-safe on v7x's 64 MiB; large enough for v5e/v6e) ----
    sub = 16 if cdt == jnp.bfloat16 else 8
    tm = min(256, _round_up(m, sub))
    tn = min(256, _round_up(out_features, 128))
    tk_target = 1024 if cdt == jnp.bfloat16 else 512
    tk = min(tk_target, _round_up(in_features, 128))

    mp = _round_up(m, tm)
    np_ = _round_up(out_features, tn)
    kp = _round_up(in_features, tk)

    # ---- zero-pad to tile multiples (zeros don't change the matmul result) ----
    if (mp, kp) != (m, in_features):
        x2 = jnp.pad(x2, ((0, mp - m), (0, kp - in_features)))
    if (kp, np_) != (in_features, out_features):
        wt = jnp.pad(wt, ((0, kp - in_features), (0, np_ - out_features)))
    bias2d = bias.reshape(1, out_features).astype(jnp.float32)
    if np_ != out_features:
        bias2d = jnp.pad(bias2d, ((0, 0), (0, np_ - out_features)))

    grid = (mp // tm, np_ // tn, kp // tk)

    out = pl.pallas_call(
        _meta_linear_kernel,
        out_shape=jax.ShapeDtypeStruct((mp, np_), out_dtype),
        grid_spec=pltpu.PrefetchScalarGridSpec(
            num_scalar_prefetch=0,
            grid=grid,
            in_specs=[
                pl.BlockSpec((tm, tk), lambda i, j, k: (i, k)),   # x tile
                pl.BlockSpec((tk, tn), lambda i, j, k: (k, j)),   # W^T tile
                pl.BlockSpec((1, tn), lambda i, j, k: (0, j)),    # bias tile
            ],
            out_specs=pl.BlockSpec((tm, tn), lambda i, j, k: (i, j)),
            scratch_shapes=[pltpu.VMEM((tm, tn), jnp.float32)],
        ),
        compiler_params=pltpu.CompilerParams(
            dimension_semantics=("parallel", "parallel", "arbitrary"),
        ),
    )(x2, wt, bias2d)

    return out[:m, :out_features].reshape(*lead, out_features)


if __name__ == "__main__":
    # Deterministic params mirroring nn.Linear(in_features, out_features):
    # weight, bias ~ U(-1/sqrt(in_features), 1/sqrt(in_features))
    key = jax.random.PRNGKey(0)
    k_x, k_w, k_b = jax.random.split(key, 3)

    batch, in_features, out_features = 8, 32, 64
    bound = 1.0 / jnp.sqrt(jnp.float32(in_features))

    x = jax.random.normal(k_x, (batch, in_features), dtype=jnp.float32)
    weight = jax.random.uniform(
        k_w, (out_features, in_features), minval=-bound, maxval=bound,
        dtype=jnp.float32)
    bias = jax.random.uniform(
        k_b, (out_features,), minval=-bound, maxval=bound, dtype=jnp.float32)

    y_ref = x @ weight.T + bias

    # f32 path (exact F.linear semantics).
    y = meta_linear(x, weight, bias)
    jax.block_until_ready(y)
    assert y.shape == (batch, out_features)
    assert jnp.allclose(y, y_ref, atol=1e-5, rtol=1e-5)

    # bf16 MXU path with f32 accumulation (the perf-preferred configuration).
    y_bf16 = meta_linear(x, weight, bias, compute_dtype=jnp.bfloat16)
    jax.block_until_ready(y_bf16)
    assert y_bf16.dtype == jnp.float32
    assert jnp.allclose(y_bf16, y_ref, atol=2e-2, rtol=2e-2)

    print("KERNEL_OK")
</pallas_src>

<mosaic_0001>
module attributes {stable_mosaic.version = 11 : i64} {
  func.func @_meta_linear_kernel(%arg0: i32, %arg1: i32, %arg2: i32, %arg3: memref<8x128xf32, #tpu.memory_space<vmem>>, %arg4: memref<128x128xf32, #tpu.memory_space<vmem>>, %arg5: memref<1x128xf32, #tpu.memory_space<vmem>>, %arg6: memref<8x128xf32, #tpu.memory_space<vmem>>, %arg7: memref<8x128xf32, #tpu.memory_space<vmem>>) attributes {dimension_semantics = [#tpu.dimension_semantics<parallel>, #tpu.dimension_semantics<parallel>, #tpu.dimension_semantics<arbitrary>], iteration_bounds = array<i64: 1, 1, 1>, scalar_prefetch = 0 : i64, scratch_operands = 1 : i64, tpu.core_type = #tpu.core_type<tc>, window_params = [{transform_indices = @transform_0, window_bounds = array<i64: 8, 128>}, {transform_indices = @transform_1, window_bounds = array<i64: 128, 128>}, {transform_indices = @transform_2, window_bounds = array<i64: 1, 128>}, {transform_indices = @transform_3, window_bounds = array<i64: 8, 128>}]} {
    %c0_i32 = arith.constant 0 : i32
    %0 = arith.cmpi eq, %arg2, %c0_i32 : i32
    %1 = arith.extui %0 : i1 to i32
    %c0_i32_0 = arith.constant 0 : i32
    %2 = arith.cmpi ne, %1, %c0_i32_0 : i32
    scf.if %2 {
      %cst_10 = arith.constant 0.000000e+00 : f32
      %12 = vector.broadcast %cst_10 : f32 to vector<8x128xf32>
      %c0_11 = arith.constant 0 : index
      %c0_12 = arith.constant 0 : index
      %13 = vector.load %arg7[%c0_11, %c0_12] : memref<8x128xf32, #tpu.memory_space<vmem>>, vector<8x128xf32>
      tpu.vector_store %arg7[%c0_11, %c0_12], %12 {strides = array<i32>} : memref<8x128xf32, #tpu.memory_space<vmem>>, vector<8x128xf32>,
    } else {
    }
    %c0 = arith.constant 0 : index
    %c0_1 = arith.constant 0 : index
    %3 = vector.load %arg7[%c0, %c0_1] : memref<8x128xf32, #tpu.memory_space<vmem>>, vector<8x128xf32>
    %c0_2 = arith.constant 0 : index
    %c0_3 = arith.constant 0 : index
    %4 = vector.load %arg3[%c0_2, %c0_3] : memref<8x128xf32, #tpu.memory_space<vmem>>, vector<8x128xf32>
    %c0_4 = arith.constant 0 : index
    %c0_5 = arith.constant 0 : index
    %5 = vector.load %arg4[%c0_4, %c0_5] : memref<128x128xf32, #tpu.memory_space<vmem>>, vector<128x128xf32>
    %cst = arith.constant dense<0.000000e+00> : vector<8x128xf32>
    %6 = tpu.matmul %4, %5, %cst {dimension_numbers = #tpu.dot_dimension_numbers<[1], [0], [0], [1], [0, 0, 1, 1], [], []>} : vector<8x128xf32>, vector<128x128xf32>, vector<8x128xf32> -> vector<8x128xf32>
    %7 = arith.addf %3, %6 : vector<8x128xf32>
    %c0_6 = arith.constant 0 : index
    %c0_7 = arith.constant 0 : index
    %8 = vector.load %arg7[%c0_6, %c0_7] : memref<8x128xf32, #tpu.memory_space<vmem>>, vector<8x128xf32>
    tpu.vector_store %arg7[%c0_6, %c0_7], %7 {strides = array<i32>} : memref<8x128xf32, #tpu.memory_space<vmem>>, vector<8x128xf32>,
    %c0_i32_8 = arith.constant 0 : i32
    %9 = arith.cmpi eq, %arg2, %c0_i32_8 : i32
    %10 = arith.extui %9 : i1 to i32
    %c0_i32_9 = arith.constant 0 : i32
    %11 = arith.cmpi ne, %10, %c0_i32_9 : i32
    scf.if %11 {
      %c0_10 = arith.constant 0 : index
      %c0_11 = arith.constant 0 : index
      %12 = vector.load %arg7[%c0_10, %c0_11] : memref<8x128xf32, #tpu.memory_space<vmem>>, vector<8x128xf32>
      %c0_12 = arith.constant 0 : index
      %c0_13 = arith.constant 0 : index
      %13 = vector.load %arg5[%c0_12, %c0_13] : memref<1x128xf32, #tpu.memory_space<vmem>>, vector<1x128xf32>
      %14 = vector.broadcast %13 : vector<1x128xf32> to vector<8x128xf32>
      %15 = arith.addf %12, %14 : vector<8x128xf32>
      %c0_14 = arith.constant 0 : index
      %c0_15 = arith.constant 0 : index
      %16 = vector.load %arg6[%c0_14, %c0_15] : memref<8x128xf32, #tpu.memory_space<vmem>>, vector<8x128xf32>
      tpu.vector_store %arg6[%c0_14, %c0_15], %15 {strides = array<i32>} : memref<8x128xf32, #tpu.memory_space<vmem>>, vector<8x128xf32>,
    } else {
    }
    return
  }
  func.func @transform_0(%arg0: i32, %arg1: i32, %arg2: i32) -> (i32, i32) {
    %c0_i32 = arith.constant 0 : i32
    return %arg0, %arg2 : i32, i32
  }
  func.func @transform_1(%arg0: i32, %arg1: i32, %arg2: i32) -> (i32, i32) {
    %c0_i32 = arith.constant 0 : i32
    return %arg2, %arg1 : i32, i32
  }
  func.func @transform_2(%arg0: i32, %arg1: i32, %arg2: i32) -> (i32, i32) {
    %c0_i32 = arith.constant 0 : i32
    %c0_i32_0 = arith.constant 0 : i32
    return %c0_i32, %arg1 : i32, i32
  }
  func.func @transform_3(%arg0: i32, %arg1: i32, %arg2: i32) -> (i32, i32) {
    %c0_i32 = arith.constant 0 : i32
    return %arg0, %arg1 : i32, i32
  }
}

</mosaic_0001>

<bundles_post_ra>
// kernel: meta_linear.1
= control target key start
LH: loop header
LB: loop body
LE: loop exit
PB: predicated region body
PF: predicated region fallthrough
CT: control target
= control target key end

     0   :  { %s192_s0 = inlined_call_operand.vmem [shape: f32[8,128], index: 0, kind: input, shape index: {}]   ;;  %s193_s1 = inlined_call_operand.vmem [shape: f32[128,128], index: 1, kind: input, shape index: {}]   ;;  %s194_s2 = inlined_call_operand.vmem [shape: f32[1,128], index: 2, kind: input, shape index: {}]   ;;  %s195_s3 = inlined_call_operand.hbm [shape: f32[8,128], index: 3, kind: output, shape index: {}]  }
   0x1   :  { %v37_v0 = vld [vmem:[%s193_s1 + $0x78] sm:$0xff]  ;;  %v36_v1 = vld [vmem:[%s193_s1 + $0x70] sm:$0xff]  ;;  %v35_v2 = vld [vmem:[%s193_s1 + $0x68] sm:$0xff] }
   0x2   :  { %38 = vmatpush.msra.mxu0 %v37_v0  ;;  %v34_v3 = vld [vmem:[%s193_s1 + $0x60] sm:$0xff]  ;;  %v33_v4 = vld [vmem:[%s193_s1 + $0x58] sm:$0xff] }
   0x4   :  { %39 = vmatpush.msra.mxu0 %v36_v1 }
   0x6   :  { %40 = vmatpush.msra.mxu0 %v35_v2 }
   0x7   :  { %8 = vsyncpa [#allocation4], 0  ;;  %v32_v5 = vld [vmem:[%s193_s1 + $0x50] sm:$0xff]  ;;  %v31_v6 = vld [vmem:[%s193_s1 + $0x48] sm:$0xff]  ;;  %s114_s21 = smov [#allocation3]   ;;  %s77_s25 = sshll.u32 %s195_s3, 4  ;;  %s78_s25 = int_to_ptr.hbm [resolvable:$true] %s77_s25 }
   0x8   :  { %41 = vmatpush.msra.mxu0 %v34_v3  ;;  %v30_v7 = vld [vmem:[%s193_s1 + $0x40] sm:$0xff]  ;;  %v29_v8 = vld [vmem:[%s193_s1 + $0x38] sm:$0xff]  ;;  %v28_v9 = vld [vmem:[%s193_s1 + $0x30] sm:$0xff]  ;;  %s75_s22 = sshll.u32 %s114_s21, 4  ;;  %s76_s22 = int_to_ptr.vmem [resolvable:$true] %s75_s22 }
   0x9   :  { %v27_v10 = vld [vmem:[%s193_s1 + $0x28] sm:$0xff]  ;;  %v26_v11 = vld [vmem:[%s193_s1 + $0x20] sm:$0xff]  ;;  %v25_v12 = vld [vmem:[%s193_s1 + $0x18] sm:$0xff] }
   0xa   :  { %42 = vmatpush.msra.mxu0 %v33_v4  ;;  %v24_v13 = vld [vmem:[%s193_s1 + $0x10] sm:$0xff]  ;;  %v23_v14 = vld [vmem:[%s193_s1 + $0x8] sm:$0xff]  ;;  %v22_v15 = vld [vmem:[%s193_s1] sm:$0xff] }
   0xb   :  { %v21_v16 = vld [vmem:[%s192_s0] sm:$0xff] }
   0xc   :  { %43 = vmatpush.msra.mxu0 %v32_v5  ;;  %v87_v17 = vld [vmem:[%s194_s2] ss:$0 sm:$0xff] }
   0xe   :  { %44 = vmatpush.msra.mxu0 %v31_v6 }
  0x10   :  { %45 = vmatpush.msra.mxu0 %v30_v7 }
  0x12   :  { %46 = vmatpush.msra.mxu0 %v29_v8 }
  0x14   :  { %47 = vmatpush.msra.mxu0 %v28_v9 }
  0x16   :  { %48 = vmatpush.msra.mxu0 %v27_v10 }
  0x18   :  { %49 = vmatpush.msra.mxu0 %v26_v11 }
  0x1a   :  { %50 = vmatpush.msra.mxu0 %v25_v12 }
  0x1c   :  { %51 = vmatpush.msra.mxu0 %v24_v13 }
  0x1e   :  { %52 = vmatpush.msra.mxu0 %v23_v14 }
  0x20   :  { %53 = vmatpush.msra.mxu0 %v22_v15 }
  0x21   :  { %54 = vmatmul.f32.vlgmr.msra.gmra.mxu0 %v21_v16 }
  0x9e   :  { %v55_v18 = vpop.f32.mrf.mxu0 }
  0x9f   :  { %v68_v19 = vadd.f32 %v87_v17, %v55_v18 }
  0xa1   :  { %69 = vst [vmem:[#allocation3] sm:$0xff] %v68_v19 }
  0xa2   :  { %80 = dma.vmem_to_hbm [thread:$0]  %s76_s22, 128, %s78_s25, [#allocation4]  }
  0xa3   :  { %112 = dma.done.wait [#allocation4], 128  }
  0xa4   :  { %113 = vsyncadd [#allocation4], 4294967168 }
  0xa5   :  { %85 = vsyncpa [#allocation4], 1 }

</bundles_post_ra>
